<compile_context>
chip_gen: v6e
topology: v6e:2x2x1
jax: 0.10.0
libtpu: 0.0.40
codegen_flags: <defaults>
</compile_context>

<pallas_src>
import functools

import jax
import jax.numpy as jnp
from jax import lax
from jax.experimental import pallas as pl
from jax.experimental.pallas import tpu as pltpu


def _round_up(x, m):
    return ((x + m - 1) // m) * m


def _tile_sizes(M, C, itemsize):
    """(tm, tc, vmem_limit_bytes) tuned per TPU generation."""
    kind = ""
    try:
        kind = jax.devices()[0].device_kind.lower()
    except Exception:  # non-TPU / interpret fallbacks
        pass
    is_v7 = "v7" in kind
    tm_cap = 1024 if is_v7 else 512
    tc_cap = 2048 if is_v7 else 1024

    # Full-extent dims need no padding and satisfy the BlockSpec rule even when
    # not (8,128)-aligned; otherwise use aligned tiles with ragged edge blocks.
    tc = C if C <= tc_cap else tc_cap
    tm = M if M <= tm_cap else tm_cap

    # v7x has 2 TensorCores: keep >=2 blocks along a parallel axis when there
    # is enough work; split rows first to stay lane-dense on the class dim.
    if is_v7 and pl.cdiv(M, tm) == 1 and pl.cdiv(C, tc) == 1 and M >= 16:
        tm = _round_up(pl.cdiv(M, 2), 8)

    # Double-buffered in + out blocks must fit scoped VMEM with headroom
    # (v7x default scoped is 32 MiB, physical only 64 MiB).
    live = 4 * tm * tc * itemsize
    vmem_limit = None
    if live > (24 << 20):
        vmem_limit = min(live + (16 << 20), 48 << 20)
    return tm, tc, vmem_limit


def _bias_kernel(col_block_offset, lh_ref, ab_ref, x_ref, o_ref):
    """lh_ref: SMEM int32[2] = [low, high]; ab_ref: SMEM f32[2] = [alpha, beta]."""
    tc = x_ref.shape[1]
    col0 = (col_block_offset + pl.program_id(1)) * tc
    # (1, tc) iota; the where-select broadcasts it over rows (cheap on VALU/vregs).
    col = col0 + lax.broadcasted_iota(jnp.int32, (1, tc), 1)
    mask = (col >= lh_ref[0]) & (col < lh_ref[1])

    x = x_ref[...]
    y = (ab_ref[0] * x.astype(jnp.float32) + ab_ref[1]).astype(x.dtype)
    o_ref[...] = jnp.where(mask, y, x)


@jax.jit
def bias_layer_forward(x, low_range, high_range, alpha, beta):
    """Non-destructive BiasLayer.forward (clone semantics); preserves x.dtype."""
    assert x.ndim == 2, "BiasLayer expects (batch, num_classes) logits"
    M, C = x.shape
    itemsize = jnp.dtype(x.dtype).itemsize
    tm, tc, vmem_limit = _tile_sizes(M, C, itemsize)

    lh = jnp.stack([jnp.asarray(low_range, jnp.int32),
                    jnp.asarray(high_range, jnp.int32)])
    ab = jnp.stack([jnp.asarray(alpha, jnp.float32),
                    jnp.asarray(beta, jnp.float32)])

    grid = (pl.cdiv(M, tm), pl.cdiv(C, tc))
    return pl.pallas_call(
        functools.partial(_bias_kernel, 0),
        grid=grid,
        in_specs=[
            pl.BlockSpec(memory_space=pltpu.MemorySpace.SMEM),   # [low, high]
            pl.BlockSpec(memory_space=pltpu.MemorySpace.SMEM),   # [alpha, beta]
            pl.BlockSpec((tm, tc), lambda i, j: (i, j)),
        ],
        out_specs=pl.BlockSpec((tm, tc), lambda i, j: (i, j)),
        out_shape=jax.ShapeDtypeStruct((M, C), x.dtype),
        compiler_params=pltpu.CompilerParams(
            dimension_semantics=("parallel", "parallel"),
            vmem_limit_bytes=vmem_limit),
        cost_estimate=pl.CostEstimate(
            flops=2 * M * C,
            transcendentals=0,
            bytes_accessed=2 * M * C * itemsize),
    )(lh, ab, x)


@functools.partial(jax.jit, static_argnums=(1, 2), donate_argnums=(0,))
def bias_layer_forward_inplace(x, low_range, high_range, alpha, beta):
    """Donating fast path: only the column tiles intersecting [low, high) are
    read/written; untouched logits never leave HBM.  The caller must donate x
    (do not reuse the input array afterwards)."""
    assert x.ndim == 2
    M, C = x.shape
    low = max(0, min(int(low_range), C))
    high = max(0, min(int(high_range), C))
    if high <= low:                       # empty stripe -> identity
        return x

    itemsize = jnp.dtype(x.dtype).itemsize
    tm, tc, vmem_limit = _tile_sizes(M, C, itemsize)

    j0 = low // tc                        # first column-block touching the stripe
    j1 = (high - 1) // tc                 # last column-block touching the stripe
    grid = (pl.cdiv(M, tm), j1 - j0 + 1)
    touched_cols = min(C, (j1 + 1) * tc) - j0 * tc

    lh = jnp.array([low, high], jnp.int32)
    ab = jnp.stack([jnp.asarray(alpha, jnp.float32),
                    jnp.asarray(beta, jnp.float32)])

    return pl.pallas_call(
        functools.partial(_bias_kernel, j0),
        grid=grid,
        in_specs=[
            pl.BlockSpec(memory_space=pltpu.MemorySpace.SMEM),   # [low, high]
            pl.BlockSpec(memory_space=pltpu.MemorySpace.SMEM),   # [alpha, beta]
            pl.BlockSpec((tm, tc), lambda i, j: (i, j0 + j)),
        ],
        out_specs=pl.BlockSpec((tm, tc), lambda i, j: (i, j0 + j)),
        out_shape=jax.ShapeDtypeStruct((M, C), x.dtype),
        input_output_aliases={2: 0},      # x (input 2) is the output buffer
        compiler_params=pltpu.CompilerParams(
            dimension_semantics=("parallel", "parallel"),
            vmem_limit_bytes=vmem_limit),
        cost_estimate=pl.CostEstimate(
            flops=2 * M * (high - low),
            transcendentals=0,
            bytes_accessed=2 * M * touched_cols * itemsize),
    )(lh, ab, x)


class BiasLayer:
    """Minimal JAX-side mirror of the PyTorch BiasLayer module (forward only)."""

    def __init__(self, alpha=1.0, beta=0.0):
        self.alpha = jnp.asarray(alpha, jnp.float32)   # nn.Parameter(torch.ones(1))
        self.beta = jnp.asarray(beta, jnp.float32)     # nn.Parameter(torch.zeros(1))

    def forward(self, x, low_range, high_range):
        # PyTorch clone semantics: the caller's x is left untouched.
        return bias_layer_forward(x, low_range, high_range, self.alpha, self.beta)

    def forward_inplace(self, x, low_range, high_range):
        # Optional donating fast path (x must not be reused by the caller).
        return bias_layer_forward_inplace(x, int(low_range), int(high_range),
                                          self.alpha, self.beta)

    def get_params(self):
        return (float(self.alpha), float(self.beta))


if __name__ == "__main__":
    key = jax.random.PRNGKey(0)

    # Small logits tensor consistent with the module: (batch, total_classes).
    batch, num_classes = 4, 20
    low_range, high_range = 10, 20                 # bias-correct the newest task's classes
    x = jax.random.normal(key, (batch, num_classes), jnp.float32)

    layer = BiasLayer(alpha=1.5, beta=-0.25)       # non-trivial params
    out = jax.block_until_ready(layer.forward(x, low_range, high_range))

    # Pure-JAX reference of the PyTorch forward.
    ref = x.at[:, low_range:high_range].set(
        layer.alpha * x[:, low_range:high_range] + layer.beta)

    assert out.shape == x.shape and out.dtype == x.dtype
    assert jnp.allclose(out, ref, atol=1e-6, rtol=1e-6), "mismatch vs reference"
    # Untouched columns must be bit-identical to the input (the "clone" part).
    assert jnp.array_equal(out[:, :low_range], x[:, :low_range])

    # bf16 input keeps its dtype (no forced f32 upcast -> half the HBM bytes).
    xb = x.astype(jnp.bfloat16)
    outb = jax.block_until_ready(layer.forward(xb, low_range, high_range))
    refb = xb.at[:, low_range:high_range].set(
        (layer.alpha * xb[:, low_range:high_range].astype(jnp.float32)
         + layer.beta).astype(jnp.bfloat16))
    assert outb.dtype == jnp.bfloat16
    assert jnp.allclose(outb.astype(jnp.float32), refb.astype(jnp.float32),
                        atol=2e-2, rtol=2e-2)
    assert jnp.array_equal(outb[:, :low_range], xb[:, :low_range])

    # Donating stripe-only variant (pass a copy so the original x stays valid).
    out_ip = jax.block_until_ready(
        layer.forward_inplace(jnp.copy(x), low_range, high_range))
    assert jnp.allclose(out_ip, ref, atol=1e-6, rtol=1e-6)

    print("KERNEL_OK")
</pallas_src>

<mosaic_0001>
module attributes {stable_mosaic.version = 11 : i64} {
  func.func @_bias_kernel(%arg0: i32, %arg1: i32, %arg2: memref<2xi32, #tpu.memory_space<smem>>, %arg3: memref<2xf32, #tpu.memory_space<smem>>, %arg4: memref<4x20xf32, #tpu.memory_space<vmem>>, %arg5: memref<4x20xf32, #tpu.memory_space<vmem>>) attributes {dimension_semantics = [#tpu.dimension_semantics<parallel>, #tpu.dimension_semantics<parallel>], iteration_bounds = array<i64: 1, 1>, scalar_prefetch = 0 : i64, scratch_operands = 0 : i64, tpu.core_type = #tpu.core_type<tc>, window_params = [{transform_indices = @transform_0, window_bounds = array<i64: 2>}, {transform_indices = @transform_1, window_bounds = array<i64: 2>}, {transform_indices = @transform_2, window_bounds = array<i64: 4, 20>}, {transform_indices = @transform_3, window_bounds = array<i64: 4, 20>}]} {
    %c0_i32 = arith.constant 0 : i32
    %0 = arith.addi %c0_i32, %arg1 : i32
    %c20_i32 = arith.constant 20 : i32
    %1 = arith.muli %0, %c20_i32 : i32
    %2 = tpu.iota {dimensions = array<i32: 1>} : vector<1x20xi32>
    %3 = vector.broadcast %1 : i32 to vector<1x20xi32>
    %4 = arith.addi %3, %2 : vector<1x20xi32>
    %c0 = arith.constant 0 : index
    %5 = memref.load %arg2[%c0] : memref<2xi32, #tpu.memory_space<smem>>
    %6 = vector.broadcast %5 : i32 to vector<1x20xi32>
    %7 = arith.cmpi sge, %4, %6 : vector<1x20xi32>
    %c1 = arith.constant 1 : index
    %8 = memref.load %arg2[%c1] : memref<2xi32, #tpu.memory_space<smem>>
    %9 = vector.broadcast %8 : i32 to vector<1x20xi32>
    %10 = arith.cmpi slt, %4, %9 : vector<1x20xi32>
    %11 = arith.andi %7, %10 : vector<1x20xi1>
    %c0_0 = arith.constant 0 : index
    %c0_1 = arith.constant 0 : index
    %12 = vector.load %arg4[%c0_0, %c0_1] : memref<4x20xf32, #tpu.memory_space<vmem>>, vector<4x20xf32>
    %c0_2 = arith.constant 0 : index
    %13 = memref.load %arg3[%c0_2] : memref<2xf32, #tpu.memory_space<smem>>
    %14 = vector.broadcast %13 : f32 to vector<4x20xf32>
    %15 = arith.mulf %14, %12 : vector<4x20xf32>
    %c1_3 = arith.constant 1 : index
    %16 = memref.load %arg3[%c1_3] : memref<2xf32, #tpu.memory_space<smem>>
    %17 = vector.broadcast %16 : f32 to vector<4x20xf32>
    %18 = arith.addf %15, %17 : vector<4x20xf32>
    %19 = vector.shape_cast %11 : vector<1x20xi1> to vector<1x20xi1>
    %20 = vector.broadcast %19 : vector<1x20xi1> to vector<4x20xi1>
    %21 = arith.select %20, %18, %12 : vector<4x20xi1>, vector<4x20xf32>
    %c0_4 = arith.constant 0 : index
    %c0_5 = arith.constant 0 : index
    %22 = vector.load %arg5[%c0_4, %c0_5] : memref<4x20xf32, #tpu.memory_space<vmem>>, vector<4x20xf32>
    tpu.vector_store %arg5[%c0_4, %c0_5], %21 {strides = array<i32>} : memref<4x20xf32, #tpu.memory_space<vmem>>, vector<4x20xf32>,
    return
  }
  func.func @transform_0(%arg0: i32, %arg1: i32) -> i32 {
    %c0_i32 = arith.constant 0 : i32
    %c0_i32_0 = arith.constant 0 : i32
    return %c0_i32 : i32
  }
  func.func @transform_1(%arg0: i32, %arg1: i32) -> i32 {
    %c0_i32 = arith.constant 0 : i32
    %c0_i32_0 = arith.constant 0 : i32
    return %c0_i32 : i32
  }
  func.func @transform_2(%arg0: i32, %arg1: i32) -> (i32, i32) {
    %c0_i32 = arith.constant 0 : i32
    return %arg0, %arg1 : i32, i32
  }
  func.func @transform_3(%arg0: i32, %arg1: i32) -> (i32, i32) {
    %c0_i32 = arith.constant 0 : i32
    return %arg0, %arg1 : i32, i32
  }
}

</mosaic_0001>

<bundles_post_ra>
// kernel: bias_layer_forward.1
= control target key start
LH: loop header
LB: loop body
LE: loop exit
PB: predicated region body
PF: predicated region fallthrough
CT: control target
= control target key end

     0   :  { %8 = vsyncpa [#allocation4], 0  ;;  %s170_s0 = inlined_call_operand.vmem [shape: s32[2], index: 0, kind: input, shape index: {}]   ;;  %s171_s1 = inlined_call_operand.vmem [shape: f32[2], index: 1, kind: input, shape index: {}]   ;;  %s172_s2 = inlined_call_operand.vmem [shape: f32[4,20], index: 2, kind: input, shape index: {}]   ;;  %s173_s3 = inlined_call_operand.hbm [shape: f32[4,20], index: 3, kind: output, shape index: {}]  }
   0x1   :  { %9 = vsyncpa [#allocation6], 0 }
   0x2   :  { %10 = vsyncpa [#allocation3], 0  ;;  %s17_s14 = sshll.u32 %s170_s0, 4  ;;  %s27_s17 = sshll.u32 %s171_s1, 4  ;;  %s18_s14 = int_to_ptr.vmem [resolvable:$true] %s17_s14  ;;  %s28_s17 = int_to_ptr.vmem [resolvable:$true] %s27_s17 }
   0x3   :  { %s85_s18 = scalar_lea.vmem %s18_s14, 16  ;;  %p90_p1 = scmp.lt.s32.totalorder %s18_s14, %s18_s14 }
   0x4   :  { %p86_p0 = scmp.ne.s32.totalorder %s18_s14, %s85_s18  ;;  %p91_p2 = scmp.lt.s32.totalorder %s85_s18, %s85_s18 }
   0x6   :  { %p92_p3 = por %p91_p2, %p90_p1 }
   0x8   :  { %p93_p4 = pnand %p92_p3, %p86_p0 }
   0xa   :  { %96 = shalt.err (!%p93_p4)
}
   0xb   :  { %s135_s19 = smov [#allocation2]   ;;  %s97_s20 = scalar_lea.vmem %s28_s17, 16 }
   0xc   :  { %20 = dma.vmem_to_smem %s18_s14, 16, %s135_s19, [#allocation4]  }
   0xd   :  { %p98_p5 = scmp.ne.s32.totalorder %s28_s17, %s97_s20  ;;  %p102_p6 = scmp.lt.s32.totalorder %s28_s17, %s28_s17 }
   0xe   :  { %p103_p7 = scmp.lt.s32.totalorder %s97_s20, %s97_s20 }
  0x10   :  { %p104_p8 = por %p103_p7, %p102_p6 }
  0x12   :  { %p105_p9 = pnand %p104_p8, %p98_p5 }
  0x14   :  { %108 = shalt.err (!%p105_p9)
}
  0x15   :  { %s136_s0 = smov [#allocation5]  }
  0x16   :  { %30 = dma.vmem_to_smem %s28_s17, 16, %s136_s0, [#allocation6]  }
  0x17   :  { %129 = dma.done.wait [#allocation4], 16  }
  0x18   :  { %130 = vsyncadd [#allocation4], 4294967280 }
  0x19   :  { %131 = dma.done.wait [#allocation6], 16  }
  0x1a   :  { %132 = vsyncadd [#allocation6], 4294967280 }
  0x1b   :  { %39 = sfence }
  0x1c   :  { %v41_v0 = vlaneseq  ;;  %s45_s1 = sld [smem:[#allocation2]]  ;;  %v52_v3 = vld [vmem:[%s172_s2] sm:$0xf]  ;;  %s137_s26 = smov [#allocation7]   ;;  %vm62_vm3 = vcmask 158720  }
  0x1d   :  { %s80_s21 = sld [smem:[#allocation2 + $0x1]]  ;;  %s70_s27 = sshll.u32 %s137_s26, 4  ;;  %s71_s27 = int_to_ptr.vmem [resolvable:$true] %s70_s27 }
  0x1e   :  { %s53_s22 = sld [smem:[#allocation5]]  ;;  %v42_v1 = vand.u32 127, %v41_v0  ;;  %s109_s28 = scalar_lea.vmem %s71_s27, 64 }
  0x1f   :  { %s81_s23 = sld [smem:[#allocation5 + $0x1]]  ;;  %p110_p10 = scmp.ne.s32.totalorder %s71_s27, %s109_s28 }
  0x20   :  { %p114_p11 = scmp.lt.s32.totalorder %s71_s27, %s71_s27  ;;  %p115_p12 = scmp.lt.s32.totalorder %s109_s28, %s109_s28 }
  0x22   :  { %v46_v2 = vstv %s45_s1  ;;  %p116_p13 = por %p115_p12, %p114_p11 }
  0x23   :  { %vm47_vm0 = vcmp.ge.s32.totalorder %v42_v1, %v46_v2  ;;  %v49_v4 = vstv %s80_s21 }
  0x24   :  { %vm50_vm1 = vcmp.lt.s32.totalorder %v42_v1, %v49_v4  ;;  %v54_v5 = vstv %s53_s22  ;;  %p117_p0 = pnand %p116_p13, %p110_p10 }
  0x25   :  { %v55_v6 = vmul.f32 %v54_v5, %v52_v3  ;;  %v57_v7 = vstv %s81_s23  ;;  %vm51_vm2 = vmand %vm47_vm0, %vm50_vm1 }
  0x27   :  { %v58_v8 = vadd.f32 %v57_v7, %v55_v6 }
  0x29   :  { %v61_v9 = vsel %vm51_vm2, %v58_v8, %v52_v3 }
  0x2a   :  { %63 = vst.msk [vmem:[#allocation7] sm:$0xf] %vm62_vm3, %v61_v9 }
  0x2b   :  { %120 = shalt.err (!%p117_p0)
}
  0x2c   :  { %73 = dma.vmem_to_hbm [thread:$0]  %s71_s27, 64, %s173_s3, [#allocation3]  }
  0x2d   :  { %133 = dma.done.wait [#allocation3], 64  }
  0x2e   :  { %134 = vsyncadd [#allocation3], 4294967232 }
  0x2f   :  { %77 = vsyncpa [#allocation3], 1 }
  0x30   :  { %78 = vsyncpa [#allocation4], 1 }
  0x31   :  { %79 = vsyncpa [#allocation6], 1 }

</bundles_post_ra>
